<compile_context>
chip_gen: v5e
topology: v5e:2x2
jax: 0.10.0
libtpu: 0.0.40
codegen_flags: <defaults>
</compile_context>

<pallas_src>
import functools

import jax
import jax.numpy as jnp
from jax.experimental import pallas as pl
from jax.experimental.pallas import tpu as pltpu


_H_RESIDENT_BYTES = 8 * 1024 * 1024   # keep h VMEM-resident up to this size


def _round_up(v, m):
    return (v + m - 1) // m * m


# ---------------------------------------------------------------------------
# stage 1: h = [x | p_t] @ (W * mask)   (single fused MXU matmul, bf16 out)
# ---------------------------------------------------------------------------
def _feature_kernel(xp_ref, w_ref, h_ref):
    h_ref[...] = jnp.dot(
        xp_ref[...], w_ref[...], preferred_element_type=jnp.float32
    ).astype(h_ref.dtype)


# ---------------------------------------------------------------------------
# stage 2: out = A @ h, accumulating directly into the output block
# ---------------------------------------------------------------------------
def _prop_kernel_resident(a_ref, h_ref, o_ref, *, tk):
    # h_ref is the full (n_k, d_pad) array, VMEM-resident (constant index_map);
    # slice the k-th (tk, d_pad) panel in-kernel.
    k = pl.program_id(1)

    @pl.when(k == 0)
    def _():
        o_ref[...] = jnp.zeros_like(o_ref)

    start = pl.multiple_of(k * tk, tk)
    o_ref[...] += jnp.dot(
        a_ref[...], h_ref[pl.ds(start, tk), :],
        preferred_element_type=jnp.float32,
    )


def _prop_kernel_streamed(a_ref, h_ref, o_ref):
    # fallback: h pipelined in (tk, d_pad) tiles (only for very large graphs).
    k = pl.program_id(1)

    @pl.when(k == 0)
    def _():
        o_ref[...] = jnp.zeros_like(o_ref)

    o_ref[...] += jnp.dot(
        a_ref[...], h_ref[...], preferred_element_type=jnp.float32
    )


# ---------------------------------------------------------------------------
# wrapper
# ---------------------------------------------------------------------------
def masked_observation_propagation(x, p_t, edge_index, edge_weights,
                                    w_x, w_p, mask,
                                    use_beta=False, edge_attr=None,
                                    return_attention_weights=None,
                                    tm=None, tk=None):
    """Forward equivalent of MaskedObservationPropagation (single-output branch).

    use_beta / edge_attr / return_attention_weights are accepted for signature
    parity; the synthetic base ignores them.
    """
    # TODO(synk): the multi-output (tuple/list) branch of the PyTorch forward is
    # pure Python structural glue around extra base outputs; only the
    # single-tensor hot path is implemented here.
    n, f_in = x.shape
    f_p = p_t.shape[1]
    d = w_x.shape[1]
    f = f_in + f_p

    if edge_weights is None:
        edge_weights = jnp.ones((edge_index.shape[1],), dtype=jnp.float32)

    d_pad = _round_up(d, 128)

    # ---- tile selection (mem-bound on A: use big tiles, v7x-safe budget) ----
    if tm is None:
        n_al = _round_up(n, 128)
        if n_al <= 128:
            tm = n_al
        else:
            # >= 2 row tiles so the "parallel" axis shards across v7x's 2 TCs,
            # capped at 1024 (2-4 MiB A tiles with tk below).
            tm = max(128, min(1024, _round_up(n_al // 2, 128)))
    else:
        tm = _round_up(tm, 128)
    if tk is None:
        tk = max(128, min(2048, _round_up(n, 128)))
    else:
        tk = _round_up(tk, 128)

    # rows and reduction dims padded independently (no lcm / divisibility bug)
    n_rows = _round_up(n, tm)
    n_k = _round_up(n, tk)

    # ---- fold the mask into the weights: (A@h)*m == A@(xp@(W*m)) ------------
    mask0 = jnp.asarray(mask[0], dtype=jnp.float32).reshape(1, d)
    w = jnp.concatenate([w_x.astype(jnp.float32),
                         w_p.astype(jnp.float32)], axis=0) * mask0
    w = jnp.pad(w, ((0, 0), (0, d_pad - d)))

    xp = jnp.concatenate([x.astype(jnp.float32),
                          p_t.astype(jnp.float32)], axis=1)
    xp = jnp.pad(xp, ((0, n_k - n), (0, 0)))

    # ---- dense adjacency, scattered straight into the padded buffer ---------
    # (f32 scatter-add for accuracy, single cast to bf16 -> 2 passes, not 3)
    adj_bf16 = (jnp.zeros((n_rows, n_k), dtype=jnp.float32)
                .at[edge_index[1], edge_index[0]]
                .add(edge_weights.astype(jnp.float32))
                .astype(jnp.bfloat16))
    # TODO(synk): for large sparse graphs a scalar-prefetch gather (O(E*D))
    # path should replace the dense O(N^2) adjacency.
    # TODO(synk): optional int8 (v5e/v6e) / fp8 (v7x) compression of A would
    # halve the dominant HBM stream if the accuracy budget allows.

    # ---- stage 1: h = [x|p_t] @ (W*mask), computed once ----------------------
    h = pl.pallas_call(
        _feature_kernel,
        out_shape=jax.ShapeDtypeStruct((n_k, d_pad), jnp.bfloat16),
        grid_spec=pltpu.PrefetchScalarGridSpec(
            num_scalar_prefetch=0,
            grid=(n_k // tk,),
            in_specs=[pl.BlockSpec((tk, f), lambda i: (i, 0)),
                      pl.BlockSpec((f, d_pad), lambda i: (0, 0))],
            out_specs=pl.BlockSpec((tk, d_pad), lambda i: (i, 0)),
        ),
        compiler_params=pltpu.CompilerParams(
            dimension_semantics=("parallel",)),
    )(xp, w)

    # ---- stage 2: out = A @ h, big tiles, h VMEM-resident when it fits ------
    h_resident = (n_k * d_pad * 2) <= _H_RESIDENT_BYTES

    grid = (n_rows // tm, n_k // tk)

    a_tile_b = tm * tk * 2                       # bf16 A tile
    o_tile_b = tm * d_pad * 4                    # f32 output tile
    h_b = (n_k * d_pad * 2) if h_resident else (tk * d_pad * 2)
    vmem_bytes = 2 * a_tile_b + 2 * h_b + 2 * o_tile_b
    # headroom, but capped at 48 MiB so the config stays safe on v7x (64 MiB).
    vmem_limit = int(min(48 * 1024 * 1024,
                         max(vmem_bytes + vmem_bytes // 4 + (2 << 20),
                             16 * 1024 * 1024)))

    h_reads = 1 if h_resident else (n_rows // tm)
    cost = pl.CostEstimate(
        flops=2 * n_rows * n_k * d_pad + 2 * n_k * f * d_pad,
        transcendentals=0,
        bytes_accessed=(n_rows * n_k * 2                 # A (bf16)
                        + h_reads * n_k * d_pad * 2      # h (bf16)
                        + n_rows * d_pad * 4             # out (f32)
                        + n_k * f * 4),                  # xp (stage 1)
    )

    if h_resident:
        prop_kernel = functools.partial(_prop_kernel_resident, tk=tk)
        h_spec = pl.BlockSpec((n_k, d_pad), lambda i, k: (0, 0))
    else:
        prop_kernel = _prop_kernel_streamed
        h_spec = pl.BlockSpec((tk, d_pad), lambda i, k: (k, 0))

    out = pl.pallas_call(
        prop_kernel,
        out_shape=jax.ShapeDtypeStruct((n_rows, d_pad), jnp.float32),
        grid_spec=pltpu.PrefetchScalarGridSpec(
            num_scalar_prefetch=0,
            grid=grid,
            in_specs=[pl.BlockSpec((tm, tk), lambda i, k: (i, k)),
                      h_spec],
            out_specs=pl.BlockSpec((tm, d_pad), lambda i, k: (i, 0)),
        ),
        compiler_params=pltpu.CompilerParams(
            dimension_semantics=("parallel", "arbitrary"),
            vmem_limit_bytes=vmem_limit),
        cost_estimate=cost,
    )(adj_bf16, h)

    return out[:n, :d]


# ---------------------------------------------------------------------------
# pure-JAX reference
# ---------------------------------------------------------------------------
def _reference(x, p_t, edge_index, edge_weights, w_x, w_p, mask):
    n = x.shape[0]
    adj = jnp.zeros((n, n), dtype=jnp.float32).at[
        edge_index[1], edge_index[0]].add(edge_weights)
    h = x @ w_x + p_t @ w_p
    return (adj @ h) * mask[0][None, :]


if __name__ == "__main__":
    key = jax.random.PRNGKey(0)
    k_x, k_p, k_wx, k_wp, k_src, k_dst, k_ew, k_m = jax.random.split(key, 8)

    N, F_IN, F_P, D, E = 16, 8, 8, 32, 40

    x = jax.random.normal(k_x, (N, F_IN), dtype=jnp.float32)
    p_t = jax.random.normal(k_p, (N, F_P), dtype=jnp.float32)
    edge_index = jnp.stack([
        jax.random.randint(k_src, (E,), 0, N),
        jax.random.randint(k_dst, (E,), 0, N),
    ], axis=0)                                        # [2, E]
    edge_weights = jax.random.uniform(k_ew, (E,), dtype=jnp.float32)

    # deterministic "module parameters"
    w_x = jax.random.normal(k_wx, (F_IN, D), dtype=jnp.float32) * 0.1
    w_p = jax.random.normal(k_wp, (F_P, D), dtype=jnp.float32) * 0.1
    # self.mask: list of per-output masks; mask[0] prunes output features
    mask = [(jax.random.uniform(k_m, (D,)) > 0.3).astype(jnp.float32)]

    out = masked_observation_propagation(x, p_t, edge_index, edge_weights,
                                          w_x, w_p, mask)
    out = jax.block_until_ready(out)

    ref = _reference(x, p_t, edge_index, edge_weights, w_x, w_p, mask)
    assert out.shape == (N, D)
    # bf16 A / h tiles on the MXU (f32 accumulation) -> looser tolerance
    assert jnp.allclose(out, ref, atol=5e-2, rtol=5e-2)

    print("KERNEL_OK")
</pallas_src>

<mosaic_0001>
module attributes {stable_mosaic.version = 11 : i64} {
  func.func @_feature_kernel(%arg0: i32, %arg1: memref<128x16xf32, #tpu.memory_space<vmem>>, %arg2: memref<16x128xf32, #tpu.memory_space<vmem>>, %arg3: memref<128x128xbf16, #tpu.memory_space<vmem>>) attributes {dimension_semantics = [#tpu.dimension_semantics<parallel>], iteration_bounds = array<i64: 1>, scalar_prefetch = 0 : i64, scratch_operands = 0 : i64, tpu.core_type = #tpu.core_type<tc>, window_params = [{transform_indices = @transform_0, window_bounds = array<i64: 128, 16>}, {pipeline_mode = #tpu.pipeline_mode<synchronous>, transform_indices = @transform_1, window_bounds = array<i64: 16, 128>}, {transform_indices = @transform_2, window_bounds = array<i64: 128, 128>}]} {
    %c0 = arith.constant 0 : index
    %c0_0 = arith.constant 0 : index
    %0 = vector.load %arg1[%c0, %c0_0] : memref<128x16xf32, #tpu.memory_space<vmem>>, vector<128x16xf32>
    %c0_1 = arith.constant 0 : index
    %c0_2 = arith.constant 0 : index
    %1 = vector.load %arg2[%c0_1, %c0_2] : memref<16x128xf32, #tpu.memory_space<vmem>>, vector<16x128xf32>
    %cst = arith.constant dense<0.000000e+00> : vector<128x128xf32>
    %2 = tpu.matmul %0, %1, %cst {dimension_numbers = #tpu.dot_dimension_numbers<[1], [0], [0], [1], [0, 0, 1, 1], [], []>} : vector<128x16xf32>, vector<16x128xf32>, vector<128x128xf32> -> vector<128x128xf32>
    %3 = arith.truncf %2 : vector<128x128xf32> to vector<128x128xbf16>
    %c0_3 = arith.constant 0 : index
    %c0_4 = arith.constant 0 : index
    %4 = vector.load %arg3[%c0_3, %c0_4] : memref<128x128xbf16, #tpu.memory_space<vmem>>, vector<128x128xbf16>
    tpu.vector_store %arg3[%c0_3, %c0_4], %3 {strides = array<i32>} : memref<128x128xbf16, #tpu.memory_space<vmem>>, vector<128x128xbf16>,
    return
  }
  func.func @transform_0(%arg0: i32) -> (i32, i32) {
    %c0_i32 = arith.constant 0 : i32
    %c0_i32_0 = arith.constant 0 : i32
    return %arg0, %c0_i32 : i32, i32
  }
  func.func @transform_1(%arg0: i32) -> (i32, i32) {
    %c0_i32 = arith.constant 0 : i32
    %c0_i32_0 = arith.constant 0 : i32
    %c0_i32_1 = arith.constant 0 : i32
    return %c0_i32, %c0_i32_0 : i32, i32
  }
  func.func @transform_2(%arg0: i32) -> (i32, i32) {
    %c0_i32 = arith.constant 0 : i32
    %c0_i32_0 = arith.constant 0 : i32
    return %arg0, %c0_i32 : i32, i32
  }
}

</mosaic_0001>

<bundles_post_ra>
// kernel: tpu_custom_call.1
= control target key start
LH: loop header
LB: loop body
LE: loop exit
PB: predicated region body
PF: predicated region fallthrough
CT: control target
= control target key end

     0   :  { %vm30_vm0 = vcmask 130048   ;;  %s383_s0 = inlined_call_operand.vmem [shape: f32[128,16], index: 0, kind: input, shape index: {}]   ;;  %s384_s1 = inlined_call_operand.vmem [shape: f32[16,128], index: 1, kind: input, shape index: {}]   ;;  %s385_s2 = inlined_call_operand.hbm [shape: bf16[128,128], index: 2, kind: output, shape index: {}]  }
   0x1   :  { %v29_v0 = vld [vmem:[%s384_s1 + $0x8] sm:$0xff]  ;;  %v28_v1 = vld [vmem:[%s384_s1] sm:$0xff] }
   0x2   :  { %93 = vmatpush.msra.mxu0 %v29_v0  ;;  %257 = vmatpush.msra.mxu1 %v29_v0  ;;  %v12_v2 = vld [vmem:[%s383_s0] sm:$0xff] }
   0x3   :  { %258 = vmatpush.msra.mxu2 %v29_v0  ;;  %259 = vmatpush.msra.mxu3 %v29_v0  ;;  %v16_v3 = vld [vmem:[%s383_s0 + $0x20] sm:$0xff] }
   0x4   :  { %94 = vmatpush.msra.mxu0 %v28_v1  ;;  %260 = vmatpush.msra.mxu1 %v28_v1  ;;  %v20_v4 = vld [vmem:[%s383_s0 + $0x40] sm:$0xff] }
   0x5   :  { %v24_v5 = vld [vmem:[%s383_s0 + $0x60] sm:$0xff]  ;;  %261 = vmatpush.msra.mxu2 %v28_v1  ;;  %262 = vmatpush.msra.mxu3 %v28_v1 }
   0x6   :  { %194 = vmatmul.msk.f32.vlgmr.msra.gmra.mxu0 %vm30_vm0, %v12_v2  ;;  %198 = vmatmul.msk.f32.vlgmr.msra.gmra.mxu1 %vm30_vm0, %v16_v3 }
   0x7   :  { %202 = vmatmul.msk.f32.vlgmr.msra.gmra.mxu2 %vm30_vm0, %v20_v4  ;;  %206 = vmatmul.msk.f32.vlgmr.msra.gmra.mxu3 %vm30_vm0, %v24_v5 }
   0x8   :  { %7 = vsyncpa [#allocation3], 0  ;;  %v13_v6 = vld [vmem:[%s383_s0 + $0x8] sm:$0xff]  ;;  %v14_v10 = vld [vmem:[%s383_s0 + $0x10] sm:$0xff]  ;;  %s182_s1 = sshll.u32 %s385_s2, 4  ;;  %s293_s19 = smov 64   ;;  %s183_s1 = int_to_ptr.hbm [resolvable:$true] %s182_s1 }
   0x9   :  { %v17_v7 = vld [vmem:[%s383_s0 + $0x28] sm:$0xff]  ;;  %v18_v11 = vld [vmem:[%s383_s0 + $0x30] sm:$0xff]  ;;  %v15_v14 = vld [vmem:[%s383_s0 + $0x18] sm:$0xff]  ;;  %s294_s20 = smov 4  }
   0xa   :  { %v21_v8 = vld [vmem:[%s383_s0 + $0x48] sm:$0xff]  ;;  %v22_v12 = vld [vmem:[%s383_s0 + $0x50] sm:$0xff]  ;;  %v19_v15 = vld [vmem:[%s383_s0 + $0x38] sm:$0xff] }
   0xb   :  { %v25_v9 = vld [vmem:[%s383_s0 + $0x68] sm:$0xff]  ;;  %v26_v13 = vld [vmem:[%s383_s0 + $0x70] sm:$0xff]  ;;  %v23_v16 = vld [vmem:[%s383_s0 + $0x58] sm:$0xff] }
   0xc   :  { %v27_v17 = vld [vmem:[%s383_s0 + $0x78] sm:$0xff]  ;;  %s292_s0 = smov [#allocation2]  }
   0xd   :  { %s180_s16 = sshll.u32 %s292_s0, 4  ;;  %s181_s16 = int_to_ptr.vmem [resolvable:$true] %s180_s16 }
   0xe   :  { %195 = vmatmul.msk.f32.gmra.mxu0 %vm30_vm0, %v13_v6  ;;  %199 = vmatmul.msk.f32.gmra.mxu1 %vm30_vm0, %v17_v7 }
   0xf   :  { %203 = vmatmul.msk.f32.gmra.mxu2 %vm30_vm0, %v21_v8  ;;  %207 = vmatmul.msk.f32.gmra.mxu3 %vm30_vm0, %v25_v9 }
  0x16   :  { %196 = vmatmul.msk.f32.gmra.mxu0 %vm30_vm0, %v14_v10  ;;  %200 = vmatmul.msk.f32.gmra.mxu1 %vm30_vm0, %v18_v11 }
  0x17   :  { %204 = vmatmul.msk.f32.gmra.mxu2 %vm30_vm0, %v22_v12  ;;  %208 = vmatmul.msk.f32.gmra.mxu3 %vm30_vm0, %v26_v13 }
  0x1e   :  { %197 = vmatmul.msk.f32.gmra.mxu0 %vm30_vm0, %v15_v14  ;;  %201 = vmatmul.msk.f32.gmra.mxu1 %vm30_vm0, %v19_v15 }
  0x1f   :  { %205 = vmatmul.msk.f32.gmra.mxu2 %vm30_vm0, %v23_v16  ;;  %209 = vmatmul.msk.f32.gmra.mxu3 %vm30_vm0, %v27_v17 }
  0x83   :  { %v96_v18 = vpop.f32.mrf.mxu0  ;;  %v108_v19 = vpop.f32.mrf.mxu1 }
  0x8a   :  { %v120_v20 = vpop.f32.mrf.mxu2  ;;  %v132_v21 = vpop.f32.mrf.mxu3 }
  0x8b   :  { %v99_v22 = vpop.f32.mrf.mxu0  ;;  %v111_v23 = vpop.f32.mrf.mxu1 }
  0x8c   :  { %v213_v24 = vpack.c.bf16 %v99_v22, %v96_v18  ;;  %v223_v25 = vpack.c.bf16 %v111_v23, %v108_v19 }
  0x8e   :  { %214 = vst [vmem:[#allocation2] sm:$0xff] %v213_v24  }
  0x8f   :  { %251 = vst [vmem:[#allocation2 + $0x10] sm:$0xff] %v223_v25  }
  0x92   :  { %v123_v26 = vpop.f32.mrf.mxu2  ;;  %v135_v27 = vpop.f32.mrf.mxu3 }
  0x93   :  { %v233_v28 = vpack.c.bf16 %v123_v26, %v120_v20  ;;  %v243_v29 = vpack.c.bf16 %v135_v27, %v132_v21  ;;  %v102_v30 = vpop.f32.mrf.mxu0  ;;  %v114_v31 = vpop.f32.mrf.mxu1 }
  0x95   :  { %253 = vst [vmem:[#allocation2 + $0x20] sm:$0xff] %v233_v28  }
  0x96   :  { %255 = vst [vmem:[#allocation2 + $0x30] sm:$0xff] %v243_v29  }
  0x9a   :  { %v126_v32 = vpop.f32.mrf.mxu2  ;;  %v138_v33 = vpop.f32.mrf.mxu3 }
  0x9b   :  { %v105_v34 = vpop.f32.mrf.mxu0  ;;  %v117_v35 = vpop.f32.mrf.mxu1 }
  0x9c   :  { %v218_v36 = vpack.c.bf16 %v105_v34, %v102_v30  ;;  %v228_v37 = vpack.c.bf16 %v117_v35, %v114_v31 }
  0x9e   :  { %250 = vst [vmem:[#allocation2 + $0x8] sm:$0xff] %v218_v36  }
  0x9f   :  { %252 = vst [vmem:[#allocation2 + $0x18] sm:$0xff] %v228_v37  }
  0xa2   :  { %v129_v38 = vpop.f32.mrf.mxu2  ;;  %v141_v39 = vpop.f32.mrf.mxu3 }
  0xa3   :  { %v238_v40 = vpack.c.bf16 %v129_v38, %v126_v32  ;;  %v248_v41 = vpack.c.bf16 %v141_v39, %v138_v33 }
  0xa5   :  { %254 = vst [vmem:[#allocation2 + $0x28] sm:$0xff] %v238_v40  }
  0xa6   :  { %256 = vst [vmem:[#allocation2 + $0x38] sm:$0xff] %v248_v41  }
  0xa7   :  { %188 = dma.vmem_to_hbm [thread:$0]  %s181_s16, 1024, %s183_s1, [#allocation3], %s293_s19, %s293_s19, %s294_s20  }
  0xa8   :  { %290 = dma.done.wait [#allocation3], 1024  }
  0xa9   :  { %291 = vsyncadd [#allocation3], 4294966272 }
  0xaa   :  { %193 = vsyncpa [#allocation3], 1 }

</bundles_post_ra>
